<compile_context>
chip_gen: v5e
topology: v5e:2x2
jax: 0.10.0
libtpu: 0.0.40
codegen_flags: <defaults>
</compile_context>

<pallas_src>
import functools

import jax
import jax.numpy as jnp
from jax.experimental import pallas as pl
from jax.experimental.pallas import tpu as pltpu


def _round_up(x, m):
    return (x + m - 1) // m * m


def _qfunction_kernel(obs_ref, act_ref, w1o_ref, w1a_ref, w2_ref, pk_ref, out_ref):
    # obs: (TB, obs_dim), act: (TB, act_dim)   [matmul_dtype]
    # w1o: (obs_dim, H), w1a: (act_dim, H), w2: (H, H)   [matmul_dtype]
    # pk:  (4, H) f32, rows = [b1, b2, w3_row, (b3, 0, ..., 0)]
    # out: (1, TB) f32   (lane-dense output block)
    f32 = jnp.float32
    obs = obs_ref[...]
    act = act_ref[...]

    # Layer 1 (concat fused: x@w1 == obs@w1_obs + act@w1_act).
    # Kept as two dots: merging them would need an in-kernel lane-offset copy,
    # and layer 2 dominates the MXU work whenever H >> obs_dim+act_dim.
    h1 = jnp.dot(obs, w1o_ref[...], preferred_element_type=f32)
    h1 = h1 + jnp.dot(act, w1a_ref[...], preferred_element_type=f32)
    h1 = jnp.maximum(h1 + pk_ref[0:1, :], 0.0)                   # bias + ReLU in f32

    # Layer 2 (cast back to the matmul dtype for the MXU, accumulate in f32).
    h2 = jnp.dot(h1.astype(w2_ref.dtype), w2_ref[...], preferred_element_type=f32)
    h2 = jnp.maximum(h2 + pk_ref[1:2, :], 0.0)                   # bias + ReLU in f32

    # Layer 3: N=1 "matmul" as VPU multiply + XLU lane reduce (free filler slots
    # next to the MXU-bound layer 2), written lane-dense as a (1, TB) row.
    w3_row = pk_ref[2:3, :]                                      # (1, H)
    q = jnp.sum(h2 * w3_row, axis=-1)                            # (TB,)
    out_ref[...] = (q[None, :] + pk_ref[3:4, 0:1]).astype(out_ref.dtype)


@functools.partial(jax.jit, static_argnames=("tile_b", "matmul_dtype"))
def qfunction_forward(obs, action, params, *, tile_b=1024, matmul_dtype=jnp.float32):
    """Pallas-backed forward of QFunction.

    obs:    (B, obs_dim)    float32
    action: (B, action_dim) float32
    params: w1 (D_in, H), b1 (H,), w2 (H, H), b2 (H,), w3 (H, 1), b3 (1,)
    matmul_dtype: dtype of the MXU operands (jnp.bfloat16 recommended on
        v6e/v7x; accumulation / biases / head stay float32).
    returns (B, 1) float32
    """
    assert obs.shape[0] == action.shape[0]
    B, obs_dim = obs.shape
    action_dim = action.shape[1]
    d_in = obs_dim + action_dim
    assert params["w1"].shape[0] == d_in, (
        "params['w1'] must have obs_dim + action_dim rows (obs-then-action order)")
    H = params["w1"].shape[1]

    obs = obs.astype(matmul_dtype)
    action = action.astype(matmul_dtype)

    # Split w1 so the concat is fused into the kernel.
    w1 = params["w1"].astype(matmul_dtype)
    w1_obs = w1[:obs_dim]                      # (obs_dim, H)
    w1_act = w1[obs_dim:]                      # (action_dim, H)
    w2 = params["w2"].astype(matmul_dtype)     # (H, H)

    # Pack all small parameters into a single f32 (4, H) VMEM-resident array.
    packed = jnp.zeros((4, H), jnp.float32)
    packed = packed.at[0].set(params["b1"].astype(jnp.float32))
    packed = packed.at[1].set(params["b2"].astype(jnp.float32))
    packed = packed.at[2].set(params["w3"].astype(jnp.float32).reshape(H))
    packed = packed.at[3, 0].set(params["b3"].astype(jnp.float32).reshape(()))

    # ---- Batch tiling ----------------------------------------------------
    LANE = 128
    if B <= tile_b:
        # Single tile: block == full padded batch (no 128-alignment needed
        # because the block equals the full array extent).
        tb = _round_up(B, 8)
        B_pad = tb
    else:
        # Multi-tile: lane-aligned tile (lane-dense out block must be a
        # multiple of 128) and capped so the grid has >= 2 steps — keeps both
        # v7x TensorCores busy and the input DMA pipelined behind compute.
        tb = _round_up(min(tile_b, (B + 1) // 2), LANE)
        B_pad = _round_up(B, tb)
    grid = (B_pad // tb,)

    if B_pad != B:
        pad = B_pad - B
        obs = jnp.pad(obs, ((0, pad), (0, 0)))
        action = jnp.pad(action, ((0, pad), (0, 0)))

    # ---- VMEM budget (double-buffered, lane-padded) and cost estimate -----
    itemsize = jnp.dtype(matmul_dtype).itemsize

    def _pad(x, m):
        return _round_up(max(int(x), 1), m)

    est_vmem = (
        2 * tb * _pad(obs_dim, LANE) * itemsize                     # obs tiles
        + 2 * tb * _pad(action_dim, LANE) * itemsize                # action tiles
        + 2 * (_pad(obs_dim, 8) + _pad(action_dim, 8) + _pad(H, 8))
            * _pad(H, LANE) * itemsize                              # w1o/w1a/w2
        + 2 * 8 * _pad(H, LANE) * 4                                 # packed (4,H)
        + 2 * 8 * _pad(tb, LANE) * 4                                # (1,tb) out
        + 4 * tb * _pad(H, LANE) * 4                                # h1/h2 f32
    )
    # v5e scoped default is 16 MiB; v7x physical is 64 MiB — stay inside both.
    vmem_limit = int(min(64 << 20, max(16 << 20, est_vmem + (2 << 20))))

    flops = 2 * B_pad * (d_in * H + H * H + H)
    bytes_accessed = int(
        B_pad * d_in * itemsize                # obs + action
        + (d_in * H + H * H) * itemsize        # weights
        + 4 * H * 4                            # packed
        + B_pad * 4                            # output
    )

    out = pl.pallas_call(
        _qfunction_kernel,
        out_shape=jax.ShapeDtypeStruct((1, B_pad), jnp.float32),
        grid=grid,
        in_specs=[
            pl.BlockSpec((tb, obs_dim), lambda i: (i, 0)),        # obs tile
            pl.BlockSpec((tb, action_dim), lambda i: (i, 0)),     # action tile
            pl.BlockSpec((obs_dim, H), lambda i: (0, 0)),         # w1_obs (resident)
            pl.BlockSpec((action_dim, H), lambda i: (0, 0)),      # w1_act (resident)
            pl.BlockSpec((H, H), lambda i: (0, 0)),               # w2     (resident)
            pl.BlockSpec((4, H), lambda i: (0, 0)),               # packed biases + w3
        ],
        out_specs=pl.BlockSpec((1, tb), lambda i: (0, i)),        # lane-dense output
        compiler_params=pltpu.CompilerParams(
            dimension_semantics=("parallel",),                    # v7x: 2 TCs
            vmem_limit_bytes=vmem_limit,
        ),
        cost_estimate=pl.CostEstimate(
            flops=flops, transcendentals=0, bytes_accessed=bytes_accessed),
    )(obs, action, w1_obs, w1_act, w2, packed)

    return out[0, :B].reshape(B, 1)


def init_params(key, obs_dim, action_dim, hidden_dim):
    """Deterministic synthetic init (uniform +-1/sqrt(fan_in), like torch Linear)."""
    d_in = obs_dim + action_dim
    k = jax.random.split(key, 6)

    def unif(k_, shape, fan_in):
        bound = 1.0 / jnp.sqrt(jnp.float32(fan_in))
        return jax.random.uniform(k_, shape, jnp.float32, -bound, bound)

    return {
        "w1": unif(k[0], (d_in, hidden_dim), d_in),
        "b1": unif(k[1], (hidden_dim,), d_in),
        "w2": unif(k[2], (hidden_dim, hidden_dim), hidden_dim),
        "b2": unif(k[3], (hidden_dim,), hidden_dim),
        "w3": unif(k[4], (hidden_dim, 1), hidden_dim),
        "b3": unif(k[5], (1,), hidden_dim),
    }


def _reference_forward(obs, action, params):
    x = jnp.concatenate([obs, action], axis=1)
    h1 = jnp.maximum(x @ params["w1"] + params["b1"], 0.0)
    h2 = jnp.maximum(h1 @ params["w2"] + params["b2"], 0.0)
    return h2 @ params["w3"] + params["b3"]


if __name__ == "__main__":
    obs_dim, action_dim, hidden_dim = 12, 4, 32
    key = jax.random.PRNGKey(0)
    k_obs, k_act, k_par, k_obs2, k_act2 = jax.random.split(key, 5)
    params = init_params(k_par, obs_dim, action_dim, hidden_dim)

    # 1) Small batch (single-tile path), strict f32.
    batch = 8
    obs = jax.random.normal(k_obs, (batch, obs_dim), jnp.float32)
    action = jax.random.normal(k_act, (batch, action_dim), jnp.float32)
    q = jax.block_until_ready(qfunction_forward(obs, action, params))
    q_ref = _reference_forward(obs, action, params)
    assert q.shape == (batch, 1)
    assert jnp.allclose(q, q_ref, atol=1e-4, rtol=1e-4)

    # 2) Larger, non-multiple batch: exercises the multi-tile grid (>= 2 steps),
    #    batch padding/slicing and the lane-dense output path.
    batch2 = 3000
    obs2 = jax.random.normal(k_obs2, (batch2, obs_dim), jnp.float32)
    action2 = jax.random.normal(k_act2, (batch2, action_dim), jnp.float32)
    q2 = jax.block_until_ready(qfunction_forward(obs2, action2, params, tile_b=512))
    q2_ref = _reference_forward(obs2, action2, params)
    assert q2.shape == (batch2, 1)
    assert jnp.allclose(q2, q2_ref, atol=1e-4, rtol=1e-4)

    # 3) bf16 matmul-operand path (recommended on v6e/v7x); f32 accumulation,
    #    validated against the f32 reference with a relaxed tolerance.
    q3 = jax.block_until_ready(
        qfunction_forward(obs2, action2, params, tile_b=512,
                          matmul_dtype=jnp.bfloat16))
    assert q3.shape == (batch2, 1)
    assert jnp.allclose(q3, q2_ref, atol=5e-2, rtol=5e-2)

    print("KERNEL_OK")
</pallas_src>

<mosaic_0001>
module attributes {stable_mosaic.version = 11 : i64} {
  func.func @_qfunction_kernel(%arg0: i32, %arg1: memref<8x12xf32, #tpu.memory_space<vmem>>, %arg2: memref<8x4xf32, #tpu.memory_space<vmem>>, %arg3: memref<12x32xf32, #tpu.memory_space<vmem>>, %arg4: memref<4x32xf32, #tpu.memory_space<vmem>>, %arg5: memref<32x32xf32, #tpu.memory_space<vmem>>, %arg6: memref<4x32xf32, #tpu.memory_space<vmem>>, %arg7: memref<1x8xf32, #tpu.memory_space<vmem>>) attributes {dimension_semantics = [#tpu.dimension_semantics<parallel>], iteration_bounds = array<i64: 1>, scalar_prefetch = 0 : i64, scratch_operands = 0 : i64, tpu.core_type = #tpu.core_type<tc>, window_params = [{transform_indices = @transform_0, window_bounds = array<i64: 8, 12>}, {transform_indices = @transform_1, window_bounds = array<i64: 8, 4>}, {pipeline_mode = #tpu.pipeline_mode<synchronous>, transform_indices = @transform_2, window_bounds = array<i64: 12, 32>}, {pipeline_mode = #tpu.pipeline_mode<synchronous>, transform_indices = @transform_3, window_bounds = array<i64: 4, 32>}, {pipeline_mode = #tpu.pipeline_mode<synchronous>, transform_indices = @transform_4, window_bounds = array<i64: 32, 32>}, {pipeline_mode = #tpu.pipeline_mode<synchronous>, transform_indices = @transform_5, window_bounds = array<i64: 4, 32>}, {transform_indices = @transform_6, window_bounds = array<i64: 1, 8>}]} {
    %c0 = arith.constant 0 : index
    %c0_0 = arith.constant 0 : index
    %0 = vector.load %arg1[%c0, %c0_0] : memref<8x12xf32, #tpu.memory_space<vmem>>, vector<8x12xf32>
    %c0_1 = arith.constant 0 : index
    %c0_2 = arith.constant 0 : index
    %1 = vector.load %arg2[%c0_1, %c0_2] : memref<8x4xf32, #tpu.memory_space<vmem>>, vector<8x4xf32>
    %c0_3 = arith.constant 0 : index
    %c0_4 = arith.constant 0 : index
    %2 = vector.load %arg3[%c0_3, %c0_4] : memref<12x32xf32, #tpu.memory_space<vmem>>, vector<12x32xf32>
    %cst = arith.constant dense<0.000000e+00> : vector<8x32xf32>
    %3 = tpu.matmul %0, %2, %cst {dimension_numbers = #tpu.dot_dimension_numbers<[1], [0], [0], [1], [0, 0, 1, 1], [], []>} : vector<8x12xf32>, vector<12x32xf32>, vector<8x32xf32> -> vector<8x32xf32>
    %c0_5 = arith.constant 0 : index
    %c0_6 = arith.constant 0 : index
    %4 = vector.load %arg4[%c0_5, %c0_6] : memref<4x32xf32, #tpu.memory_space<vmem>>, vector<4x32xf32>
    %cst_7 = arith.constant dense<0.000000e+00> : vector<8x32xf32>
    %5 = tpu.matmul %1, %4, %cst_7 {dimension_numbers = #tpu.dot_dimension_numbers<[1], [0], [0], [1], [0, 0, 1, 1], [], []>} : vector<8x4xf32>, vector<4x32xf32>, vector<8x32xf32> -> vector<8x32xf32>
    %6 = arith.addf %3, %5 : vector<8x32xf32>
    %c0_8 = arith.constant 0 : index
    %c0_9 = arith.constant 0 : index
    %7 = vector.load %arg6[%c0_8, %c0_9] : memref<4x32xf32, #tpu.memory_space<vmem>>, vector<1x32xf32>
    %8 = vector.broadcast %7 : vector<1x32xf32> to vector<8x32xf32>
    %9 = arith.addf %6, %8 : vector<8x32xf32>
    %cst_10 = arith.constant 0.000000e+00 : f32
    %10 = vector.broadcast %cst_10 : f32 to vector<8x32xf32>
    %11 = arith.maximumf %9, %10 : vector<8x32xf32>
    %c0_11 = arith.constant 0 : index
    %c0_12 = arith.constant 0 : index
    %12 = vector.load %arg5[%c0_11, %c0_12] : memref<32x32xf32, #tpu.memory_space<vmem>>, vector<32x32xf32>
    %cst_13 = arith.constant dense<0.000000e+00> : vector<8x32xf32>
    %13 = tpu.matmul %11, %12, %cst_13 {dimension_numbers = #tpu.dot_dimension_numbers<[1], [0], [0], [1], [0, 0, 1, 1], [], []>} : vector<8x32xf32>, vector<32x32xf32>, vector<8x32xf32> -> vector<8x32xf32>
    %c1 = arith.constant 1 : index
    %c0_14 = arith.constant 0 : index
    %14 = vector.load %arg6[%c1, %c0_14] : memref<4x32xf32, #tpu.memory_space<vmem>>, vector<1x32xf32>
    %15 = vector.broadcast %14 : vector<1x32xf32> to vector<8x32xf32>
    %16 = arith.addf %13, %15 : vector<8x32xf32>
    %cst_15 = arith.constant 0.000000e+00 : f32
    %17 = vector.broadcast %cst_15 : f32 to vector<8x32xf32>
    %18 = arith.maximumf %16, %17 : vector<8x32xf32>
    %c2 = arith.constant 2 : index
    %c0_16 = arith.constant 0 : index
    %19 = vector.load %arg6[%c2, %c0_16] : memref<4x32xf32, #tpu.memory_space<vmem>>, vector<1x32xf32>
    %20 = vector.broadcast %19 : vector<1x32xf32> to vector<8x32xf32>
    %21 = arith.mulf %18, %20 : vector<8x32xf32>
    %cst_17 = arith.constant dense<0.000000e+00> : vector<8xf32>
    %22 = vector.multi_reduction <add>, %21, %cst_17 [1] : vector<8x32xf32> to vector<8xf32>
    %23 = vector.shape_cast %22 : vector<8xf32> to vector<1x8xf32>
    %c3 = arith.constant 3 : index
    %c0_18 = arith.constant 0 : index
    %24 = vector.load %arg6[%c3, %c0_18] : memref<4x32xf32, #tpu.memory_space<vmem>>, vector<1x1xf32>
    %25 = vector.broadcast %24 : vector<1x1xf32> to vector<1x8xf32>
    %26 = arith.addf %23, %25 : vector<1x8xf32>
    %c0_19 = arith.constant 0 : index
    %c0_20 = arith.constant 0 : index
    %27 = vector.load %arg7[%c0_19, %c0_20] : memref<1x8xf32, #tpu.memory_space<vmem>>, vector<1x8xf32>
    tpu.vector_store %arg7[%c0_19, %c0_20], %26 {strides = array<i32>} : memref<1x8xf32, #tpu.memory_space<vmem>>, vector<1x8xf32>,
    return
  }
  func.func @transform_0(%arg0: i32) -> (i32, i32) {
    %c0_i32 = arith.constant 0 : i32
    %c0_i32_0 = arith.constant 0 : i32
    return %arg0, %c0_i32 : i32, i32
  }
  func.func @transform_1(%arg0: i32) -> (i32, i32) {
    %c0_i32 = arith.constant 0 : i32
    %c0_i32_0 = arith.constant 0 : i32
    return %arg0, %c0_i32 : i32, i32
  }
  func.func @transform_2(%arg0: i32) -> (i32, i32) {
    %c0_i32 = arith.constant 0 : i32
    %c0_i32_0 = arith.constant 0 : i32
    %c0_i32_1 = arith.constant 0 : i32
    return %c0_i32, %c0_i32_0 : i32, i32
  }
  func.func @transform_3(%arg0: i32) -> (i32, i32) {
    %c0_i32 = arith.constant 0 : i32
    %c0_i32_0 = arith.constant 0 : i32
    %c0_i32_1 = arith.constant 0 : i32
    return %c0_i32, %c0_i32_0 : i32, i32
  }
  func.func @transform_4(%arg0: i32) -> (i32, i32) {
    %c0_i32 = arith.constant 0 : i32
    %c0_i32_0 = arith.constant 0 : i32
    %c0_i32_1 = arith.constant 0 : i32
    return %c0_i32, %c0_i32_0 : i32, i32
  }
  func.func @transform_5(%arg0: i32) -> (i32, i32) {
    %c0_i32 = arith.constant 0 : i32
    %c0_i32_0 = arith.constant 0 : i32
    %c0_i32_1 = arith.constant 0 : i32
    return %c0_i32, %c0_i32_0 : i32, i32
  }
  func.func @transform_6(%arg0: i32) -> (i32, i32) {
    %c0_i32 = arith.constant 0 : i32
    %c0_i32_0 = arith.constant 0 : i32
    return %c0_i32, %arg0 : i32, i32
  }
}

</mosaic_0001>

<bundles_post_ra>
// kernel: qfunction_forward.1
= control target key start
LH: loop header
LB: loop body
LE: loop exit
PB: predicated region body
PF: predicated region fallthrough
CT: control target
= control target key end

     0   :  { %11 = vsyncpa [#allocation3], 0  ;;  %s322_s0 = inlined_call_operand.vmem [shape: f32[8,12], index: 0, kind: input, shape index: {}]   ;;  %s323_s1 = inlined_call_operand.vmem [shape: f32[8,4], index: 1, kind: input, shape index: {}]   ;;  %s324_s2 = inlined_call_operand.hbm [shape: f32[12,32], index: 2, kind: input, shape index: {}]   ;;  %s325_s3 = inlined_call_operand.vmem [shape: f32[4,32], index: 3, kind: input, shape index: {}]   ;;  %s326_s4 = inlined_call_operand.vmem [shape: f32[32,32], index: 4, kind: input, shape index: {}]   ;;  %s327_s5 = inlined_call_operand.vmem [shape: f32[4,32], index: 5, kind: input, shape index: {}]   ;;  %s328_s6 = inlined_call_operand.hbm [shape: f32[1,8], index: 6, kind: output, shape index: {}]  }
   0x1   :  { %12 = vsyncpa [#allocation4], 0  ;;  %s21_s23 = sshll.u32 %s324_s2, 4  ;;  %s243_s24 = smov [#allocation2]   ;;  %s22_s23 = int_to_ptr.hbm [resolvable:$true] %s21_s23 }
   0x2   :  { %s23_s25 = sshll.u32 %s243_s24, 4  ;;  %s244_s26 = smov 128   ;;  %s24_s25 = int_to_ptr.vmem [resolvable:$true] %s23_s25 }
   0x3   :  { %s245_s27 = smov 8  }
   0x4   :  { %29 = dma.hbm_to_vmem [thread:$0]  %s22_s23, 256, %s24_s25, [#allocation3], %s244_s26, %s244_s26, %s245_s27  }
   0x5   :  { %239 = dma.done.wait [#allocation3], 256  }
   0x6   :  { %240 = vsyncadd [#allocation3], 4294967040  ;;  %vm49_vm0 = vcmask 1043456   ;;  %vm45_vm1 = vcmask 31744   ;;  %v43_v0 = vld [vmem:[#allocation2 + $0x8] sm:$0xf]  ;;  %v153_v28 = vlaneseq }
   0x7   :  { %v44_v1 = vld [vmem:[%s325_s3] sm:$0xf]  ;;  %178 = vmatpush.msk.msra.mxu1 %vm49_vm0, %v43_v0  ;;  %vm73_vm2 = vcmask 97280   ;;  %v107_v5 = vld [vmem:[%s326_s4 + $0x18] sm:$0xff]  ;;  %v106_v6 = vld [vmem:[%s326_s4 + $0x10] sm:$0xff]  ;;  %v246_v10 = vmov 0  }
   0x8   :  { %v42_v2 = vld [vmem:[#allocation2] sm:$0xff]  ;;  %176 = vmatpush.msk.msra.mxu0 %vm49_vm0, %v44_v1  ;;  %126 = vmatpush.msra.mxu2 %v107_v5  ;;  %v105_v7 = vld [vmem:[%s326_s4 + $0x8] sm:$0xff]  ;;  %vm110_vm3 = vcmask 261120   ;;  %v154_v29 = vand.u32 127, %v153_v28  ;;  %s247_s21 = smov [#allocation5]   ;;  %s166_s25 = sshll.u32 %s328_s6, 4  ;;  %s167_s25 = int_to_ptr.hbm [resolvable:$true] %s166_s25 }
   0x9   :  { %v41_v3 = vld [vmem:[%s323_s1] sm:$0xff]  ;;  %95 = vmatpush.msra.mxu1 %v42_v2  ;;  %186 = vset.pattern.permute.xlu0 %v246_v10  ;;  %s164_s22 = sshll.u32 %s247_s21, 4  ;;  %vm157_vm4 = vcmask 57344   ;;  %s165_s22 = int_to_ptr.vmem [resolvable:$true] %s164_s22 }
   0xa   :  { %v40_v4 = vld [vmem:[%s322_s0] sm:$0xff]  ;;  %177 = vmatmul.msk.f32.vlgmr.msra.gmra.mxu0 %vm45_vm1, %v41_v3  ;;  %127 = vmatpush.msra.mxu2 %v106_v6 }
   0xb   :  { %179 = vmatmul.msk.f32.vlgmr.msra.gmra.mxu1 %vm73_vm2, %v40_v4  ;;  %v104_v8 = vld [vmem:[%s326_s4] sm:$0xff]  ;;  %187 = vset.pattern.permute.xlu1 %v246_v10 }
   0xc   :  { %128 = vmatpush.msra.mxu2 %v105_v7  ;;  %v141_v9 = vld [vmem:[%s327_s5 + $0x3] sm:$0x1]  ;;  %v188_v12 = vld [vmem:[%s327_s5] ss:$0 sm:$0xff]  ;;  %v189_v17 = vld [vmem:[%s327_s5 + $0x1] ss:$0 sm:$0xff] }
   0xd   :  { %144 = vperm.xlu0 %186, %v141_v9   ;;  %v190_v20 = vld [vmem:[%s327_s5 + $0x2] ss:$0 sm:$0xff] }
   0xe   :  { %129 = vmatpush.msra.mxu2 %v104_v8 }
  0x7f   :  { %v145_v24 = vpop.permute.xlu0 %144 }
  0x80   :  { %v146_v25 = vperm.slane %v145_v24, 0 }
  0x87   :  { %v70_v11 = vpop.f32.mrf.mxu0 }
  0x88   :  { %v97_v13 = vpop.f32.mrf.mxu1 }
  0x89   :  { %v98_v14 = vadd.f32 %v97_v13, %v70_v11 }
  0x8b   :  { %v102_v15 = vadd.f32 %v188_v12, %v98_v14 }
  0x8d   :  { %v103_v16 = vmax.f32 %v102_v15, 0.0 }
  0x8f   :  { %180 = vmatmul.msk.f32.vlgmr.msra.gmra.mxu2 %vm110_vm3, %v103_v16 }
 0x112   :  { %v131_v18 = vpop.f32.mrf.mxu2 }
 0x113   :  { %v132_v19 = vadd.f32 %v189_v17, %v131_v18 }
 0x115   :  { %v134_v21 = vmax.f32 %v132_v19, 0.0 }
 0x117   :  { %v137_v22 = vmul.f32 %v190_v20, %v134_v21 }
 0x119   :  { %v138_v23 = vsel %vm110_vm3, %v137_v22, 0.0 }
 0x11a   :  { %139 = vadd.xlane.f32.xlu0 %v138_v23 }
 0x18d   :  { %v140_v26 = vpop.xlane.xlu0 %139 }
 0x18e   :  { %v148_v27 = vadd.f32 %v146_v25, %v140_v26 }
 0x190   :  { %151 = vperm.xlu1 %187, %v148_v27  }
 0x202   :  { %v152_v30 = vpop.permute.xlu1 %151 }
 0x203   :  { %v155_v31 = vperm.slane %v152_v30, %v154_v29 }
 0x205   :  { %158 = vst.msk [vmem:[#allocation5] sm:$0x1] %vm157_vm4, %v155_v31 }
 0x206   :  { %169 = dma.vmem_to_hbm [thread:$0]  %s165_s22, 16, %s167_s25, [#allocation4]  }
 0x207   :  { %241 = dma.done.wait [#allocation4], 16  }
 0x208   :  { %242 = vsyncadd [#allocation4], 4294967280 }
 0x209   :  { %174 = vsyncpa [#allocation3], 1 }
 0x20a   :  { %175 = vsyncpa [#allocation4], 1 }

</bundles_post_ra>
